<compile_context>
chip_gen: v5e
topology: v5e:2x2
jax: 0.10.0
libtpu: 0.0.40
codegen_flags: <defaults>
</compile_context>

<pallas_src>
import functools

import jax
import jax.numpy as jnp
from jax.experimental import pallas as pl
from jax.experimental.pallas import tpu as pltpu


# --------------------------------------------------------------------------- #
# Kernel
# --------------------------------------------------------------------------- #
def _neg_soft_assign_kernel(x_ref, o_ref, *, alpha):
    # x_ref/o_ref: (bn, C, TILE_HW) tile in VMEM.
    # Reduction over axis 1 (channels / sublanes); lanes (spatial) stay dense.
    x = x_ref[...]
    xf = x.astype(jnp.float32)
    x_min = jnp.min(xf, axis=1, keepdims=True)          # (bn, 1, TILE_HW)
    e = jnp.exp((x_min - xf) * alpha)                   # args <= 0 -> no overflow
    denom = jnp.sum(e, axis=1, keepdims=True)           # >= 1
    o_ref[...] = (e / denom).astype(o_ref.dtype)        # exact division


# --------------------------------------------------------------------------- #
# Tiling heuristics
# --------------------------------------------------------------------------- #
_TILE_VMEM_BUDGET = 12 * 1024 * 1024    # double-buffered in+out tile footprint
_TARGET_STEP_BYTES = 4 * 1024 * 1024    # amortize ~0.35us (~600 cyc) per grid step
_VMEM_LIMIT_BYTES = 32 * 1024 * 1024    # safe on v5e/v6e (128 MiB) and v7x (64 MiB)


def _ceil_div(a, b):
    return (a + b - 1) // b


def _choose_tiling(n, c, hw, in_itemsize, out_itemsize):
    """Return (bn, tile_hw)."""
    per_lane = c * (in_itemsize + out_itemsize)          # in+out bytes per lane col

    # ---- lane (H*W) tiling: biggest tile the VMEM budget allows ----------
    if 2 * hw * per_lane <= _TILE_VMEM_BUDGET:
        tile_hw = hw                                     # full extent: always legal
    else:
        cap = max(128, (_TILE_VMEM_BUDGET // (2 * per_lane)) // 128 * 128)
        tile_hw = cap                                    # one masked partial block ok
    grid_hw = _ceil_div(hw, tile_hw)

    # ---- batch folding when H*W alone can't reach the per-step target ----
    bn = 1
    if grid_hw == 1 and n > 1:
        per_batch = hw * per_lane
        bn_vmem = max(1, _TILE_VMEM_BUDGET // (2 * per_batch))
        bn_target = max(1, _ceil_div(_TARGET_STEP_BYTES, per_batch))
        bn = min(n, bn_vmem, bn_target)
        # keep >= 2 blocks on the (parallel) batch axis for v7x dual-TC
        bn = max(1, min(bn, _ceil_div(n, 2)))

    # ---- single image + tiny grid: split H*W so both v7x TCs get work ----
    if n == 1 and grid_hw == 1 and hw >= 256:
        half = _ceil_div(hw, 2)
        tile_hw = _ceil_div(half, 128) * 128

    return bn, tile_hw


# --------------------------------------------------------------------------- #
# Wrapper
# --------------------------------------------------------------------------- #
def neg_soft_assign(x, alpha=32.0, dims=1):
    """x: (N, C, H, W) array (NCHW, like the PyTorch module). dims must be 1."""
    assert dims == 1, "kernel implements reduction over the channel dim (dims=1)"
    n, c, h, w = x.shape
    hw = h * w

    in_item = jnp.dtype(x.dtype).itemsize
    out_item = in_item

    # NCHW -> (N, C, H*W): metadata-only reshape, no HBM round-trip.
    x3 = x.reshape(n, c, hw)

    bn, tile_hw = _choose_tiling(n, c, hw, in_item, out_item)
    grid = (pl.cdiv(n, bn), pl.cdiv(hw, tile_hw))

    kernel = functools.partial(_neg_soft_assign_kernel, alpha=float(alpha))

    cost = pl.CostEstimate(
        flops=5 * n * c * hw,
        transcendentals=n * c * hw,
        bytes_accessed=n * c * hw * (in_item + out_item),
    )

    out3 = pl.pallas_call(
        kernel,
        out_shape=jax.ShapeDtypeStruct((n, c, hw), x.dtype),
        grid_spec=pltpu.PrefetchScalarGridSpec(
            num_scalar_prefetch=0,
            grid=grid,
            in_specs=[pl.BlockSpec((bn, c, tile_hw), lambda b, i: (b, 0, i))],
            out_specs=pl.BlockSpec((bn, c, tile_hw), lambda b, i: (b, 0, i)),
        ),
        compiler_params=pltpu.CompilerParams(
            dimension_semantics=("parallel", "parallel"),
            vmem_limit_bytes=_VMEM_LIMIT_BYTES,
        ),
        cost_estimate=cost,
    )(x3)

    # (N, C, H*W) -> NCHW: metadata-only reshape.
    return out3.reshape(n, c, h, w)


# --------------------------------------------------------------------------- #
# Reference & test
# --------------------------------------------------------------------------- #
def _reference(x, alpha=32.0, dims=1):
    x_min = jnp.min(x, axis=dims, keepdims=True)
    e = jnp.exp(-alpha * (x - x_min))
    return e / jnp.sum(e, axis=dims, keepdims=True)


if __name__ == "__main__":
    key = jax.random.PRNGKey(0)
    N, C, H, W = 2, 4, 16, 16  # small NCHW input, consistent with dims=1 usage
    x = jax.random.normal(key, (N, C, H, W), dtype=jnp.float32)

    out = jax.block_until_ready(neg_soft_assign(x, alpha=32.0, dims=1))
    ref = _reference(x, alpha=32.0, dims=1)
    assert out.shape == x.shape and out.dtype == x.dtype
    assert jnp.allclose(out, ref, atol=1e-5, rtol=1e-5), "mismatch vs reference"

    # Single-image path (exercises the H*W split that keeps both v7x TCs busy).
    x1 = jax.random.normal(jax.random.PRNGKey(1), (1, C, H, W), dtype=jnp.float32)
    out1 = jax.block_until_ready(neg_soft_assign(x1, alpha=32.0, dims=1))
    assert jnp.allclose(out1, _reference(x1), atol=1e-5, rtol=1e-5), "mismatch (n=1)"

    print("KERNEL_OK")
</pallas_src>

<mosaic_0001>
module attributes {stable_mosaic.version = 11 : i64} {
  func.func @_neg_soft_assign_kernel(%arg0: i32, %arg1: i32, %arg2: memref<1x4x256xf32, #tpu.memory_space<vmem>>, %arg3: memref<1x4x256xf32, #tpu.memory_space<vmem>>) attributes {dimension_semantics = [#tpu.dimension_semantics<parallel>, #tpu.dimension_semantics<parallel>], iteration_bounds = array<i64: 2, 1>, scalar_prefetch = 0 : i64, scratch_operands = 0 : i64, tpu.core_type = #tpu.core_type<tc>, window_params = [{transform_indices = @transform_0, window_bounds = array<i64: 1, 4, 256>}, {transform_indices = @transform_1, window_bounds = array<i64: 1, 4, 256>}]} {
    %c0 = arith.constant 0 : index
    %c0_0 = arith.constant 0 : index
    %c0_1 = arith.constant 0 : index
    %0 = vector.load %arg2[%c0, %c0_0, %c0_1] : memref<1x4x256xf32, #tpu.memory_space<vmem>>, vector<1x4x256xf32>
    %cst = arith.constant dense<0x7F800000> : vector<1x256xf32>
    %1 = vector.multi_reduction <minimumf>, %0, %cst [1] : vector<1x4x256xf32> to vector<1x256xf32>
    %2 = vector.shape_cast %1 : vector<1x256xf32> to vector<1x1x256xf32>
    %3 = vector.broadcast %2 : vector<1x1x256xf32> to vector<1x4x256xf32>
    %4 = arith.subf %3, %0 : vector<1x4x256xf32>
    %cst_2 = arith.constant 3.200000e+01 : f32
    %5 = vector.broadcast %cst_2 : f32 to vector<1x4x256xf32>
    %6 = arith.mulf %4, %5 : vector<1x4x256xf32>
    %7 = math.exp %6 : vector<1x4x256xf32>
    %cst_3 = arith.constant dense<0.000000e+00> : vector<1x256xf32>
    %8 = vector.multi_reduction <add>, %7, %cst_3 [1] : vector<1x4x256xf32> to vector<1x256xf32>
    %9 = vector.shape_cast %8 : vector<1x256xf32> to vector<1x1x256xf32>
    %10 = vector.broadcast %9 : vector<1x1x256xf32> to vector<1x4x256xf32>
    %11 = arith.divf %7, %10 : vector<1x4x256xf32>
    %c0_4 = arith.constant 0 : index
    %c0_5 = arith.constant 0 : index
    %c0_6 = arith.constant 0 : index
    %12 = vector.load %arg3[%c0_4, %c0_5, %c0_6] : memref<1x4x256xf32, #tpu.memory_space<vmem>>, vector<1x4x256xf32>
    tpu.vector_store %arg3[%c0_4, %c0_5, %c0_6], %11 {strides = array<i32>} : memref<1x4x256xf32, #tpu.memory_space<vmem>>, vector<1x4x256xf32>,
    return
  }
  func.func @transform_0(%arg0: i32, %arg1: i32) -> (i32, i32, i32) {
    %c0_i32 = arith.constant 0 : i32
    %c0_i32_0 = arith.constant 0 : i32
    return %arg0, %c0_i32, %arg1 : i32, i32, i32
  }
  func.func @transform_1(%arg0: i32, %arg1: i32) -> (i32, i32, i32) {
    %c0_i32 = arith.constant 0 : i32
    %c0_i32_0 = arith.constant 0 : i32
    return %arg0, %c0_i32, %arg1 : i32, i32, i32
  }
}

</mosaic_0001>

<bundles_post_ra>
// kernel: tpu_custom_call.1
= control target key start
LH: loop header
LB: loop body
LE: loop exit
PB: predicated region body
PF: predicated region fallthrough
CT: control target
= control target key end

     0   :  { %6 = vsyncpa [#allocation3], 0  ;;  %s683_s0 = inlined_call_operand.hbm [shape: f32[2,4,256], index: 0, kind: input, shape index: {}]   ;;  %s684_s1 = inlined_call_operand.hbm [shape: f32[2,4,256], index: 1, kind: output, shape index: {}]  }
   0x1   :  { %8 = vsyncpa [#allocation3 + $0x1], 0 }
   0x2   :  { %9 = vsyncpa [#allocation4], 0 }
   0x3   :  { %11 = vsyncpa [#allocation4 + $0x1], 0  ;;  %s554_s6 = smov 0   ;;  %s556_s7 = smov 0  }
   0x4   :  { %s558_s8 = smov 0   ;;  %s560_s9 = smov 0  }
   0x5   :  { %s562_s10 = smov 0   ;;  %s564_s11 = smov 0  }
   0x6 LB: > { %s343_s12 = sadd.s32 4294967295, %s542_s11   ;;  %s344_s13 = sadd.s32 4294967294, %s542_s11   ;;  %s542_s11 = sphi %s564_s11, %s17_s11   ;;  %s538_s10 = sphi %s562_s10, %s693_s10   ;;  %s534_s9 = sphi %s560_s9, %s692_s9   ;;  %s530_s8 = sphi %s558_s8, %s691_s8   ;;  %s526_s7 = sphi %s556_s7, %s690_s7   ;;  %s522_s6 = sphi %s554_s6, %s689_s6  }
   0x7   : > { %s29_s14 = sadd.s32 1, %s538_s10  ;;  %s38_s15 = sadd.s32 1, %s530_s8 }
   0x8   : > { %p31_p0 = scmp.ge.s32.totalorder %s29_s14, 2  ;;  %p45_p1 = scmp.ne.s32.totalorder %s530_s8, %s526_s7 }
   0x9   : > { %p46_p2 = scmp.eq.s32.totalorder %s542_s11, 0  ;;  %p51_p3 = scmp.ne.s32.totalorder %s526_s7, %s522_s6 }
   0xa   : > { %s695_s14 = smov (%p31_p0, %s29_s14), 0  ;;  %p52_p5 = scmp.eq.s32.totalorder %s343_s12, 0 }
   0xb   : > { %p595_p4 = por %p46_p2, %p45_p1  ;;  %s33_s17 = ssub.s32 %s538_s10, %s695_s14 }
   0xc   : > { %p77_p6 = scmp.eq.s32.totalorder %s343_s12, 1  ;;  %p36_p7 = scmp.eq.s32.totalorder %s33_s17, 0 }
   0xd   : > { %p601_p8 = por %p52_p5, %p51_p3  ;;  %p83_p10 = scmp.eq.s32.totalorder %s344_s13, 1 }
   0xe   : > { %p605_p9 = por %p77_p6, %p45_p1  ;;  %p346_p12 = scmp.ge.s32.totalorder %s542_s11, 2 }
   0xf   : > { %s610_s20 = scalar_select %p36_p7, %s530_s8, %s38_s15  }
  0x10   : > { %p612_p11 = por %p83_p10, %p51_p3  ;;  %p372_p13 = scmp.lt.s32.totalorder %s542_s11, 2 }
  0x11   : > { %s103_s22 = sand.u32 1, %s530_s8   ;;  %s358_s24 = sshll.u32 %s538_s10, 3 }
  0x12   : > { %s347_s23 = sshll.u32 %s103_s22, 3  ;;  %s114_s27 = scalar_lea.hbm %s683_s0, %s358_s24 }
  0x13   : > { %s107_s28 = scalar_lea.vmem [#allocation2], %s347_s23  ;;  %s116_s30 = sshll.u32 %s114_s27, 4  ;;  %s117_s30 = int_to_ptr.hbm [resolvable:$true] %s116_s30 }
  0x14   : > { %s118_s29 = sshll.u32 %s107_s28, 4  ;;  %p365_p0 = pnand %p372_p13, %p595_p4  ;;  %s119_s29 = int_to_ptr.vmem [resolvable:$true] %s118_s29 }
  0x15   : > { %p350_p1 = scmp.ge.s32.totalorder %s542_s11, 1  ;;  %p123_p2 = scmp.lt.s32.totalorder %s542_s11, 3 }
  0x16   : > { %s104_s2 = scalar_lea.sflag [#allocation3], %s103_s22 }
  0x17   : > { %367 = dma.hbm_to_vmem [thread:$0]  (!%p365_p0), %s117_s30, 128, %s119_s29, %s104_s2  }
  0x18   : > { %p124_p3 = pnand %p350_p1, %p123_p2 }
  0x19   : > { %s628_s3 = sand.u32 (!%p124_p3), 1, %s526_s7  }
  0x1a   : > { %127 = sbr.rel (%p124_p3) target bundleno = 106 (0x6a), region = 24  ;;  %s351_s4 = sshll.u32 (!%p124_p3), %s628_s3, 3 }
  0x1b   : > { %s130_s5 = scalar_lea.sflag (!%p124_p3), [#allocation3], %s628_s3  ;;  %s133_s12 = scalar_lea.vmem (!%p124_p3), [#allocation2], %s351_s4 }
  0x1f   : > { %513 = dma.done.wait (%p601_p8), %s130_s5, 128  }
  0x20   : > { %515 = vsyncadd (%p601_p8), %s130_s5, 4294967168  ;;  %v155_v0 = vld [vmem:[%s133_s12] sm:$0xff]  ;;  %vm162_vm0 = vcmask 1043456   ;;  %s359_s13 = sshll.u32 %s534_s9, 3  ;;  %s152_s9 = scalar_lea.vmem [#allocation5], %s351_s4 }
  0x21   : > { %157 = vst [vmem:[#allocation1] ss:$2 sm:$0xff] %v155_v0  ;;  %s254_s17 = scalar_lea.hbm %s684_s1, %s359_s13  ;;  %s256_s18 = sshll.u32 %s152_s9, 4  ;;  %s257_s18 = int_to_ptr.vmem [resolvable:$true] %s256_s18 }
  0x22   : > { %s258_s22 = sshll.u32 %s254_s17, 4  ;;  %s241_s23 = scalar_lea.sflag [#allocation4], %s628_s3  ;;  %s259_s22 = int_to_ptr.hbm [resolvable:$true] %s258_s22 }
  0x23   : > { %s474_s24 = sshra.s32 %s259_s22, 4  ;;  %s480_s28 = scalar_lea.hbm %s684_s1, 16  ;;  %s475_s24 = int_to_ptr.hbm [resolvable:$true] %s474_s24 }
  0x24   : > { %s476_s25 = scalar_lea.hbm %s475_s24, 8  ;;  %p481_p7 = scmp.lt.s32.totalorder %s475_s24, %s684_s1 }
  0x25   : > { %p477_p4 = scmp.ne.s32.totalorder %s475_s24, %s476_s25  ;;  %p482_p8 = scmp.lt.s32.totalorder %s480_s28, %s476_s25 }
  0x27   : > { %p478_p5 = pnand %p477_p4, %p605_p9  ;;  %p483_p10 = por %p482_p8, %p481_p7 }
  0x28   : > { %v158_v1 = vld.sshfl [vmem:[#allocation1] sm:$0xff pattern:$0x75316420]  ;;  %v159_v2 = vld.sshfl [vmem:[#allocation1 + $0x8] sm:$0xff pattern:$0x75316420] }
  0x29   : > { %v163_v3 = vsel %vm162_vm0, %v158_v1, inf  ;;  %v170_v4 = vsel %vm162_vm0, %v159_v2, inf  ;;  %177 = vst [vmem:[#allocation1] ss:$2 sm:$0xff] %v155_v0  ;;  %p479_p6 = pneg %p478_p5 }
  0x2a   : > { %v164_v5 = vrot.slane %v163_v3, 4  ;;  %v171_v6 = vrot.slane %v170_v4, 4 }
  0x2b   : > { %p484_p13 = pnand %p483_p10, %p479_p6 }
  0x2c   : > { %v165_v7 = vmin.f32 %v163_v3, %v164_v5  ;;  %v172_v8 = vmin.f32 %v170_v4, %v171_v6 }
  0x2e   : > { %v166_v9 = vrot.slane %v165_v7, 2  ;;  %v173_v10 = vrot.slane %v172_v8, 2 }
  0x30   : > { %v167_v11 = vmin.f32 %v165_v7, %v166_v9  ;;  %v174_v12 = vmin.f32 %v172_v8, %v173_v10  ;;  %v178_v15 = vld.sshfl [vmem:[#allocation1] sm:$0xff pattern:$0x75316420]  ;;  %v179_v16 = vld.sshfl [vmem:[#allocation1 + $0x8] sm:$0xff pattern:$0x75316420] }
  0x32   : > { %v168_v13 = vrot.slane %v167_v11, 1  ;;  %v175_v14 = vrot.slane %v174_v12, 1 }
  0x34   : > { %v169_v17 = vmin.f32 %v167_v11, %v168_v13  ;;  %v176_v18 = vmin.f32 %v174_v12, %v175_v14 }
  0x36   : > { %v182_v19 = vsub.f32 %v169_v17, %v178_v15  ;;  %v183_v20 = vsub.f32 %v176_v18, %v179_v16 }
  0x38   : > { %v185_v21 = vmul.f32 32.0, %v183_v20  ;;  %v184_v22 = vmul.f32 32.0, %v182_v19 }
  0x3a   : > { %v186_v23 = vmul.f32 1.442695, %v184_v22  ;;  %v188_v24 = vmul.f32 1.442695, %v185_v21 }
  0x3c   : > { %422 = vpow2.f32 %v186_v23 }
  0x3d   : > { %424 = vpow2.f32 %v188_v24 }
  0x42   : > { %v423_v25 = vpop.eup %422 }
  0x43   : > { %v425_v26 = vpop.eup %424  ;;  %v190_v27 = vsel %vm162_vm0, %v423_v25, 0.0 }
  0x44   : > { %v191_v28 = vrot.slane %v190_v27, 4  ;;  %v197_v29 = vsel %vm162_vm0, %v425_v26, 0.0 }
  0x45   : > { %v198_v30 = vrot.slane %v197_v29, 4 }
  0x46   : > { %v192_v31 = vadd.f32 %v191_v28, %v190_v27 }
  0x47   : > { %v199_v32 = vadd.f32 %v198_v30, %v197_v29 }
  0x48   : > { %v193_v33 = vrot.slane %v192_v31, 2 }
  0x49   : > { %v200_v34 = vrot.slane %v199_v32, 2 }
  0x4a   : > { %v194_v35 = vadd.f32 %v193_v33, %v192_v31 }
  0x4b   : > { %v201_v36 = vadd.f32 %v200_v34, %v199_v32 }
  0x4c   : > { %v195_v37 = vrot.slane %v194_v35, 1 }
  0x4d   : > { %v202_v38 = vrot.slane %v201_v36, 1 }
  0x4e   : > { %v196_v39 = vadd.f32 %v195_v37, %v194_v35 }
  0x4f   : > { %v203_v40 = vadd.f32 %v202_v38, %v201_v36 }
  0x50   : > { %426 = vrcp.f32 %v196_v39  ;;  %v215_v48 = vand.u32 2147483648, %v196_v39  ;;  %v213_v50 = vand.u32 2147483647, %v196_v39  ;;  %vm209_vm3 = vweird.f32 %v196_v39 }
  0x51   : > { %428 = vrcp.f32 %v203_v40  ;;  %v230_v49 = vand.u32 2147483648, %v203_v40  ;;  %v228_v52 = vand.u32 2147483647, %v203_v40  ;;  %vm224_vm5 = vweird.f32 %v203_v40 }
  0x52   : > { %v216_v56 = vor.u32 1.1754944e-38, %v215_v48  ;;  %vm214_vm7 = vcmp.eq.f32.partialorder %v213_v50, 8.507059e+37 }
  0x53   : > { %v231_v57 = vor.u32 1.1754944e-38, %v230_v49  ;;  %vm229_vm8 = vcmp.eq.f32.partialorder %v228_v52, 8.507059e+37 }
  0x56   : > { %v427_v41 = vpop.eup %426 }
  0x57   : > { %v429_v42 = vpop.eup %428  ;;  %v205_v43 = vmul.f32 %v427_v41, %v196_v39  ;;  %vm210_vm1 = vweird.f32 %v427_v41 }
  0x58   : > { %v220_v44 = vmul.f32 %v429_v42, %v203_v40  ;;  %vm225_vm2 = vweird.f32 %v429_v42  ;;  %vm211_vm4 = vmor %vm209_vm3, %vm210_vm1 }
  0x59   : > { %v206_v45 = vsub.f32 1.0, %v205_v43  ;;  %vm226_vm6 = vmor %vm224_vm5, %vm225_vm2 }
  0x5a   : > { %v221_v46 = vsub.f32 1.0, %v220_v44 }
  0x5b   : > { %v207_v47 = vmul.f32 %v427_v41, %v206_v45 }
  0x5c   : > { %v222_v51 = vmul.f32 %v429_v42, %v221_v46 }
  0x5d   : > { %v208_v53 = vadd.f32 %v427_v41, %v207_v47 }
  0x5e   : > { %v223_v54 = vadd.f32 %v429_v42, %v222_v51 }
  0x5f   : > { %v212_v55 = vsel %vm211_vm4, %v427_v41, %v208_v53 }
  0x60   : > { %v227_v58 = vsel %vm226_vm6, %v429_v42, %v223_v54  ;;  %v217_v59 = vsel %vm214_vm7, %v216_v56, %v212_v55 }
  0x61   : > { %v232_v60 = vsel %vm229_vm8, %v231_v57, %v227_v58  ;;  %v218_v62 = vmul.f32 %v423_v25, %v217_v59 }
  0x62   : > { %v233_v61 = vmul.f32 %v425_v26, %v232_v60 }
  0x64   : > { %v236_v63 = vrot.slane %v233_v61, 4 }
  0x66   : > { %v237_v0 = vsel %vm162_vm0, %v218_v62, %v236_v63 }
  0x67   : > { %239 = vst [vmem:[%s152_s9] sm:$0xff] %v237_v0 }
  0x68   : > { %487 = shalt.err (!%p484_p13)
}
  0x69   : > { %362 = dma.vmem_to_hbm [thread:$0]  (%p605_p9), %s257_s18, 128, %s259_s22, %s241_s23  }
  0x6a PF: > { %s270_s2 = sand.u32 1, %s522_s6   ;;  %p369_p0 = pnand %p346_p12, %p612_p11 }
  0x6b   : > { %s271_s3 = scalar_lea.sflag [#allocation4], %s270_s2 }
  0x6c   : > { %p370_p1 = pneg %p369_p0 }
  0x6e   : > { %517 = dma.done.wait (%p370_p1), %s271_s3, 128  }
  0x6f   : > { %519 = vsyncadd (%p370_p1), %s271_s3, 4294967168  ;;  %s17_s11 = sadd.s32 1, %s542_s11   ;;  %s689_s6 = smov %s526_s7 }
  0x70   : > { %p14_p2 = scmp.ge.s32.totalorder %s17_s11, 4   ;;  %s690_s7 = smov %s530_s8 }
  0x71   : > { %s691_s8 = smov %s610_s20  ;;  %s692_s9 = smov %s538_s10 }
  0x72   : > { %s693_s10 = smov %s695_s14  ;;  %16 = sbr.rel (!%p14_p2) target bundleno = 6 (0x6), region = 69 }
  0x77   :  { %277 = vsyncpa [#allocation3], 1 }
  0x78   :  { %279 = vsyncpa [#allocation3 + $0x1], 1 }
  0x79   :  { %280 = vsyncpa [#allocation4], 1 }
  0x7a   :  { %282 = vsyncpa [#allocation4 + $0x1], 1 }

</bundles_post_ra>
